<compile_context>
chip_gen: v7x
topology: tpu7x:2x2x1
jax: 0.10.0
libtpu: 0.0.40
codegen_flags: <defaults>
</compile_context>

<pallas_src>
import jax
import jax.numpy as jnp
from jax.experimental import pallas as pl
from jax.experimental.pallas import tpu as pltpu


# ---------------------------------------------------------------------------
# Primary path: zero-copy via input/output aliasing.
# ---------------------------------------------------------------------------
def _alias_noop_kernel(x_hbm, o_hbm):
    # Output buffer IS the (already expand_dims'ed) input buffer; just pin a
    # read+write dependency on it so the aliased output materializes.
    del x_hbm
    pltpu.touch(o_hbm)


def _unsqueeze0_alias(x):
    x5 = jnp.expand_dims(x, 0)  # metadata-only reshape in the wrapper
    return pl.pallas_call(
        _alias_noop_kernel,
        out_shape=jax.ShapeDtypeStruct(x5.shape, x5.dtype),
        in_specs=[pl.BlockSpec(memory_space=pl.ANY)],
        out_specs=pl.BlockSpec(memory_space=pl.ANY),
        input_output_aliases={0: 0},  # output aliases (donates) x5's buffer
        compiler_params=pltpu.CompilerParams(has_side_effects=True),
        cost_estimate=pl.CostEstimate(flops=0, transcendentals=0, bytes_accessed=0),
    )(x5)


# ---------------------------------------------------------------------------
# Fallback path: single HBM->HBM async DMA (known-good from previous round).
# ---------------------------------------------------------------------------
def _copy_dma_kernel(x_hbm, o_hbm, sem):
    # o_hbm has shape (1, *x.shape); o_hbm.at[0] is an x-shaped view of it.
    cp = pltpu.make_async_copy(x_hbm, o_hbm.at[0], sem)
    cp.start()
    cp.wait()


def _unsqueeze0_copy(x):
    nbytes = x.size * x.dtype.itemsize
    return pl.pallas_call(
        _copy_dma_kernel,
        out_shape=jax.ShapeDtypeStruct((1,) + x.shape, x.dtype),
        in_specs=[pl.BlockSpec(memory_space=pl.ANY)],
        out_specs=pl.BlockSpec(memory_space=pl.ANY),
        scratch_shapes=[pltpu.SemaphoreType.DMA(())],  # shaped, forward-compatible
        cost_estimate=pl.CostEstimate(
            flops=0, transcendentals=0, bytes_accessed=2 * nbytes
        ),
    )(x)


def unsqueeze0(x):
    """Equivalent of torch.Tensor.unsqueeze(0): adds a leading axis of size 1."""
    try:
        return _unsqueeze0_alias(x)
    except Exception:
        # If the zero-copy aliased form is rejected on this runtime, fall back
        # to the single-descriptor HBM->HBM DMA copy.
        return _unsqueeze0_copy(x)


if __name__ == "__main__":
    key = jax.random.PRNGKey(0)
    # Small NCHW input consistent with the module's identity-style forward.
    x = jax.random.normal(key, (2, 4, 16, 16), dtype=jnp.float32)

    y = unsqueeze0(x)
    jax.block_until_ready(y)

    # Semantic check against plain-JAX reference (x[None] == unsqueeze(0)).
    assert y.shape == (1, 2, 4, 16, 16), y.shape
    assert y.dtype == x.dtype
    assert bool(jnp.array_equal(y, x[None]))

    print("KERNEL_OK")
</pallas_src>

<mosaic_0001>
module attributes {stable_mosaic.version = 11 : i64} {
  func.func @_alias_noop_kernel(%arg0: memref<1x2x4x16x16xf32, #tpu.memory_space<any>>, %arg1: memref<1x2x4x16x16xf32, #tpu.memory_space<any>>) attributes {dimension_semantics = [], scalar_prefetch = 0 : i64, scratch_operands = 0 : i64, tpu.core_type = #tpu.core_type<tc>} {
    return
  }
}

module attributes {stable_mosaic.version = 11 : i64} {
  func.func @_copy_dma_kernel(%arg0: memref<2x4x16x16xf32, #tpu.memory_space<any>>, %arg1: memref<1x2x4x16x16xf32, #tpu.memory_space<any>>, %arg2: memref<!tpu.dma_semaphore, #tpu.memory_space<semaphore_mem>>) attributes {dimension_semantics = [], scalar_prefetch = 0 : i64, scratch_operands = 1 : i64, tpu.core_type = #tpu.core_type<tc>} {
    %c0_i32 = arith.constant 0 : i32
    %c0_i32_0 = arith.constant 0 : i32
    %c0_i32_1 = arith.constant 0 : i32
    %c0_i32_2 = arith.constant 0 : i32
    %c0_i32_3 = arith.constant 0 : i32
    %0 = tpu.memref_slice %arg1[%c0_i32, %c0_i32_0, %c0_i32_1, %c0_i32_2, %c0_i32_3] : memref<1x2x4x16x16xf32, #tpu.memory_space<any>> -> memref<1x2x4x16x16xf32, #tpu.memory_space<any>>
    %1 = tpu.memref_squeeze %0 : memref<1x2x4x16x16xf32, #tpu.memory_space<any>> -> memref<2x4x16x16xf32, #tpu.memory_space<any>>
    tpu.enqueue_dma source(%arg0 : memref<2x4x16x16xf32, #tpu.memory_space<any>>) target(%1 : memref<2x4x16x16xf32, #tpu.memory_space<any>>) target_semaphore(%arg2 : memref<!tpu.dma_semaphore, #tpu.memory_space<semaphore_mem>>)
    %c0_i32_4 = arith.constant 0 : i32
    %c0_i32_5 = arith.constant 0 : i32
    %c0_i32_6 = arith.constant 0 : i32
    %c0_i32_7 = arith.constant 0 : i32
    %c0_i32_8 = arith.constant 0 : i32
    %2 = tpu.memref_slice %arg1[%c0_i32_4, %c0_i32_5, %c0_i32_6, %c0_i32_7, %c0_i32_8] : memref<1x2x4x16x16xf32, #tpu.memory_space<any>> -> memref<1x2x4x16x16xf32, #tpu.memory_space<any>>
    %3 = tpu.memref_squeeze %2 : memref<1x2x4x16x16xf32, #tpu.memory_space<any>> -> memref<2x4x16x16xf32, #tpu.memory_space<any>>
    tpu.wait_dma2 semaphore(%arg2 : memref<!tpu.dma_semaphore, #tpu.memory_space<semaphore_mem>>) src(%arg0 : memref<2x4x16x16xf32, #tpu.memory_space<any>>) dst(%3 : memref<2x4x16x16xf32, #tpu.memory_space<any>>)
    return
  }
}

</mosaic_0001>

<bundles_post_ra>
// kernel: tpu_custom_call.1
= control target key start
LH: loop header
LB: loop body
LE: loop exit
PB: predicated region body
PF: predicated region fallthrough
CT: control target
= control target key end

     0   :  { %s16_s0 = inlined_call_operand.hbm [shape: f32[1,2,4,16,16], index: 0, kind: input, shape index: {}, may-alias: {0,1}]   ;;  %s17_s1 = inlined_call_operand.hbm [shape: f32[1,2,4,16,16], index: 1, kind: output, shape index: {}, may-alias: {0,1}]  }

// kernel: tpu_custom_call.1
= control target key start
LH: loop header
LB: loop body
LE: loop exit
PB: predicated region body
PF: predicated region fallthrough
CT: control target
= control target key end

     0   :  { %s36_s6 = smov [#allocation2]   ;;  %s37_s7 = smov [#allocation3]   ;;  %s55_s0 = inlined_call_operand.hbm [shape: f32[2,4,16,16], index: 0, kind: input, shape index: {}]   ;;  %s56_s1 = inlined_call_operand.hbm [shape: f32[1,2,4,16,16], index: 1, kind: output, shape index: {}]  }
   0x1   :  { %s38_s8 = smov 0  }
   0x2   :  { %18 = dma.general %s55_s0, 2048, %s56_s1, %s36_s6, %s37_s7, [#allocation4], %s38_s8, 0  }
   0x3   :  { %34 = dma.done.wait [#allocation2], 2048 }
   0x4   :  { %35 = vsyncadd [#allocation2], 4294965248 }
   0x5   :  { %24 = vsyncmov [#allocation2] }
   0x8   :  { %s25_s13 = vpop.sfrf %24 }
   0x9   :  { %p30_p0 = scmp.ne.s32.totalorder %s25_s13, 0 }
   0xb   :  { %29 = shalt.err (%p30_p0)  }

</bundles_post_ra>
